<compile_context>
chip_gen: v6e
topology: v6e:2x2x1
jax: 0.10.0
libtpu: 0.0.40
codegen_flags: <defaults>
</compile_context>

<pallas_src>
import jax
import jax.numpy as jnp
from jax.experimental import pallas as pl
from jax.experimental.pallas import tpu as pltpu


def _fused_mlp_kernel(x_ref, w_ref, b_ref, o_ref):
    # x_ref: [tr, K] lane-dense VMEM tile; w_ref: [K, P] VMEM-resident fused
    # block-diagonal weight; b_ref: [1, 1] scalar bias in SMEM.
    y = jnp.dot(x_ref[...], w_ref[...], preferred_element_type=jnp.float32)
    o_ref[...] = jnp.tanh(y + b_ref[0, 0]).astype(o_ref.dtype)


def prepare_fused_params(w1, b1, w2, b2, w3, b3):
    """Collapse the affine stack once (call outside the per-step hot path).

    Returns (w_packed [P*in_dim, P], b_fused [1, 1]) where P is the lane-packing
    factor (P*in_dim == 128 when in_dim divides 128, else P == 1).
    """
    in_dim = w1.shape[0]
    pack = 128 // in_dim if (in_dim <= 128 and 128 % in_dim == 0) else 1
    w_fused = (w1 @ w2 @ w3).astype(jnp.float32)                  # [in_dim, 1]
    b_fused = (b1 @ w2 @ w3 + b2 @ w3 + b3).astype(jnp.float32)   # [1, 1]
    if pack > 1:
        # Block-diagonal weight: packed_x[r] @ w_packed yields P outputs/row.
        w_packed = jnp.kron(jnp.eye(pack, dtype=jnp.float32), w_fused)
    else:
        w_packed = w_fused
    return w_packed, b_fused


def mlp_forward_fused(x, w_packed, b_fused, *, block_rows=8192):
    """Forward with pre-fused params. x: [B, in_dim] f32 -> [B, 1] f32."""
    batch, in_dim = x.shape
    k_dim, pack = w_packed.shape
    assert k_dim == pack * in_dim

    # Pad only when batch is not a multiple of the packing factor (<= pack-1
    # rows); the common case pays no extra HBM copy.
    pad = (-batch) % pack
    if pad:
        x = jnp.pad(x, ((0, pad), (0, 0)))
    rows = (batch + pad) // pack

    # Free, contiguous reshape to a lane-dense [rows, pack*in_dim] slab.
    xp = x.reshape(rows, k_dim)

    # Row tile: multiple of 8 (sublane); ragged last tile handled by Pallas.
    block_rows = max(8, (block_rows // 8) * 8)
    if rows < 8:
        tr = rows                              # full-dim block for tiny batches
    else:
        tr = min(block_rows, (rows // 8) * 8)
    grid = (pl.cdiv(rows, tr),)

    out = pl.pallas_call(
        _fused_mlp_kernel,
        out_shape=jax.ShapeDtypeStruct((rows, pack), jnp.float32),
        grid=grid,
        in_specs=[
            pl.BlockSpec((tr, k_dim), lambda i: (i, 0)),     # x: tiled over batch
            pl.BlockSpec((k_dim, pack), lambda i: (0, 0)),   # weight: VMEM-resident
            pl.BlockSpec(memory_space=pltpu.SMEM),           # scalar bias in SMEM
        ],
        out_specs=pl.BlockSpec((tr, pack), lambda i: (i, 0)),
        compiler_params=pltpu.CompilerParams(
            dimension_semantics=("parallel",),
            vmem_limit_bytes=32 * 1024 * 1024,
        ),
    )(xp, w_packed, b_fused)

    out = out.reshape(rows * pack, 1)          # free (contiguous) unpack to [B, 1]
    if pad:
        out = out[:batch]
    return out


def mlp_forward(x, w1, b1, w2, b2, w3, b3, *, block_rows=8192):
    """Convenience one-shot forward (fuses weights per call)."""
    w_packed, b_fused = prepare_fused_params(w1, b1, w2, b2, w3, b3)
    return mlp_forward_fused(x, w_packed, b_fused, block_rows=block_rows)


def init_params(key, input_size, fc1_dim, fc2_dim):
    """Deterministic init mirroring nn.Linear shapes (stored pre-transposed)."""
    ks = jax.random.split(key, 6)

    def uniform(k, shape, fan_in):
        bound = 1.0 / jnp.sqrt(fan_in)
        return jax.random.uniform(k, shape, jnp.float32, -bound, bound)

    w1 = uniform(ks[0], (input_size, fc1_dim), input_size)   # fc1.weight.T
    b1 = uniform(ks[1], (1, fc1_dim), input_size)            # fc1.bias
    w2 = uniform(ks[2], (fc1_dim, fc2_dim), fc1_dim)         # fc2.weight.T
    b2 = uniform(ks[3], (1, fc2_dim), fc1_dim)               # fc2.bias
    w3 = uniform(ks[4], (fc2_dim, 1), fc2_dim)               # out.weight.T
    b3 = uniform(ks[5], (1, 1), fc2_dim)                     # out.bias
    return w1, b1, w2, b2, w3, b3


if __name__ == "__main__":
    key = jax.random.PRNGKey(0)
    k_x, k_p = jax.random.split(key)

    batch, input_size, fc1_dim, fc2_dim = 8, 32, 64, 32
    x = jax.random.normal(k_x, (batch, input_size), jnp.float32)
    w1, b1, w2, b2, w3, b3 = init_params(k_p, input_size, fc1_dim, fc2_dim)

    # One-time weight fusion, hoisted out of the per-call path.
    w_packed, b_fused = prepare_fused_params(w1, b1, w2, b2, w3, b3)

    fwd = jax.jit(mlp_forward_fused, static_argnames=("block_rows",))

    # Small batch: single packed lane-dense tile.
    out = jax.block_until_ready(fwd(x, w_packed, b_fused))
    ref = jnp.tanh(((x @ w1 + b1) @ w2 + b2) @ w3 + b3)
    assert out.shape == (batch, 1)
    assert jnp.allclose(out, ref, atol=1e-5, rtol=1e-5)

    # Larger ragged batch: multi-step grid with a partial (masked) last tile,
    # no jnp.pad and no output-slice copy (1000 is a multiple of pack=4).
    xb = jax.random.normal(k_x, (1000, input_size), jnp.float32)
    outb = jax.block_until_ready(fwd(xb, w_packed, b_fused, block_rows=64))
    refb = jnp.tanh(((xb @ w1 + b1) @ w2 + b2) @ w3 + b3)
    assert outb.shape == (1000, 1)
    assert jnp.allclose(outb, refb, atol=1e-5, rtol=1e-5)

    print("KERNEL_OK")
</pallas_src>

<mosaic_0001>
module attributes {stable_mosaic.version = 11 : i64} {
  func.func @_fused_mlp_kernel(%arg0: i32, %arg1: memref<2x128xf32, #tpu.memory_space<vmem>>, %arg2: memref<128x4xf32, #tpu.memory_space<vmem>>, %arg3: memref<1x1xf32, #tpu.memory_space<smem>>, %arg4: memref<2x4xf32, #tpu.memory_space<vmem>>) attributes {dimension_semantics = [#tpu.dimension_semantics<parallel>], iteration_bounds = array<i64: 1>, scalar_prefetch = 0 : i64, scratch_operands = 0 : i64, tpu.core_type = #tpu.core_type<tc>, window_params = [{transform_indices = @transform_0, window_bounds = array<i64: 2, 128>}, {pipeline_mode = #tpu.pipeline_mode<synchronous>, transform_indices = @transform_1, window_bounds = array<i64: 128, 4>}, {transform_indices = @transform_2, window_bounds = array<i64: 1, 1>}, {transform_indices = @transform_3, window_bounds = array<i64: 2, 4>}]} {
    %c0 = arith.constant 0 : index
    %c0_0 = arith.constant 0 : index
    %0 = vector.load %arg1[%c0, %c0_0] : memref<2x128xf32, #tpu.memory_space<vmem>>, vector<2x128xf32>
    %c0_1 = arith.constant 0 : index
    %c0_2 = arith.constant 0 : index
    %1 = vector.load %arg2[%c0_1, %c0_2] : memref<128x4xf32, #tpu.memory_space<vmem>>, vector<128x4xf32>
    %cst = arith.constant dense<0.000000e+00> : vector<2x4xf32>
    %2 = tpu.matmul %0, %1, %cst {dimension_numbers = #tpu.dot_dimension_numbers<[1], [0], [0], [1], [0, 0, 1, 1], [], []>} : vector<2x128xf32>, vector<128x4xf32>, vector<2x4xf32> -> vector<2x4xf32>
    %c0_3 = arith.constant 0 : index
    %c0_4 = arith.constant 0 : index
    %3 = memref.load %arg3[%c0_3, %c0_4] : memref<1x1xf32, #tpu.memory_space<smem>>
    %4 = vector.broadcast %3 : f32 to vector<2x4xf32>
    %5 = arith.addf %2, %4 : vector<2x4xf32>
    %6 = math.tanh %5 : vector<2x4xf32>
    %c0_5 = arith.constant 0 : index
    %c0_6 = arith.constant 0 : index
    %7 = vector.load %arg4[%c0_5, %c0_6] : memref<2x4xf32, #tpu.memory_space<vmem>>, vector<2x4xf32>
    tpu.vector_store %arg4[%c0_5, %c0_6], %6 {strides = array<i32>} : memref<2x4xf32, #tpu.memory_space<vmem>>, vector<2x4xf32>,
    return
  }
  func.func @transform_0(%arg0: i32) -> (i32, i32) {
    %c0_i32 = arith.constant 0 : i32
    %c0_i32_0 = arith.constant 0 : i32
    return %arg0, %c0_i32 : i32, i32
  }
  func.func @transform_1(%arg0: i32) -> (i32, i32) {
    %c0_i32 = arith.constant 0 : i32
    %c0_i32_0 = arith.constant 0 : i32
    %c0_i32_1 = arith.constant 0 : i32
    return %c0_i32, %c0_i32_0 : i32, i32
  }
  func.func @transform_2(%arg0: i32) -> (i32, i32) {
    %c0_i32 = arith.constant 0 : i32
    %c0_i32_0 = arith.constant 0 : i32
    %c0_i32_1 = arith.constant 0 : i32
    return %c0_i32, %c0_i32_0 : i32, i32
  }
  func.func @transform_3(%arg0: i32) -> (i32, i32) {
    %c0_i32 = arith.constant 0 : i32
    %c0_i32_0 = arith.constant 0 : i32
    return %arg0, %c0_i32 : i32, i32
  }
}

</mosaic_0001>

<bundles_post_ra>
// kernel: mlp_forward_fused.1
= control target key start
LH: loop header
LB: loop body
LE: loop exit
PB: predicated region body
PF: predicated region fallthrough
CT: control target
= control target key end

     0   :  { %v167_v0 = vmov 0.0   ;;  %vm168_vm0 = vmmov 0   ;;  %vm105_vm1 = vcmask 25600   ;;  %s246_s1 = inlined_call_operand.vmem [shape: f32[128,4], index: 1, kind: input, shape index: {}]   ;;  %s247_s0 = inlined_call_operand.vmem [shape: f32[2,128], index: 0, kind: input, shape index: {}]   ;;  %s248_s2 = inlined_call_operand.<no memory space> [shape: f32[1,1], index: 2, kind: input, shape index: {}]   ;;  %s249_s3 = inlined_call_operand.vmem [shape: f32[2,4], index: 3, kind: output, shape index: {}]  }
   0x1   :  { %128 = vmatprep.subr.mxu0 %v167_v0  ;;  %v31_v1 = vld [vmem:[%s246_s1 + $0x78] sm:$0xff]  ;;  %v30_v2 = vld [vmem:[%s246_s1 + $0x70] sm:$0xff]  ;;  %160 = vmatprep.mubr.msk.f32.mxu0 %vm168_vm0, %v167_v0  ;;  %v29_v3 = vld [vmem:[%s246_s1 + $0x68] sm:$0xff]  ;;  %v33_v18 = vstv %s248_s2 }
   0x2   :  { %129 = vmatpush3.msra.mxu0 %v31_v1  ;;  %v28_v4 = vld [vmem:[%s246_s1 + $0x60] sm:$0xff]  ;;  %v27_v5 = vld [vmem:[%s246_s1 + $0x58] sm:$0xff]  ;;  %v26_v6 = vld [vmem:[%s246_s1 + $0x50] sm:$0xff] }
   0x3   :  { %130 = vmatprep.subr.mxu0 %v167_v0  ;;  %v25_v7 = vld [vmem:[%s246_s1 + $0x48] sm:$0xff]  ;;  %v24_v8 = vld [vmem:[%s246_s1 + $0x40] sm:$0xff]  ;;  %v23_v9 = vld [vmem:[%s246_s1 + $0x38] sm:$0xff] }
   0x4   :  { %131 = vmatpush3.msra.mxu0 %v30_v2  ;;  %v22_v10 = vld [vmem:[%s246_s1 + $0x30] sm:$0xff]  ;;  %v21_v11 = vld [vmem:[%s246_s1 + $0x28] sm:$0xff]  ;;  %v20_v12 = vld [vmem:[%s246_s1 + $0x20] sm:$0xff] }
   0x5   :  { %132 = vmatprep.subr.mxu0 %v167_v0  ;;  %v19_v13 = vld [vmem:[%s246_s1 + $0x18] sm:$0xff]  ;;  %v18_v14 = vld [vmem:[%s246_s1 + $0x10] sm:$0xff]  ;;  %v17_v15 = vld [vmem:[%s246_s1 + $0x8] sm:$0xff] }
   0x6   :  { %133 = vmatpush3.msra.mxu0 %v29_v3  ;;  %v16_v16 = vld [vmem:[%s246_s1] sm:$0xff] }
   0x7   :  { %134 = vmatprep.subr.mxu0 %v167_v0  ;;  %v15_v17 = vld [vmem:[%s247_s0] sm:$0x3] }
   0x8   :  { %135 = vmatpush3.msra.mxu0 %v28_v4 }
   0x9   :  { %136 = vmatprep.subr.mxu0 %v167_v0 }
   0xa   :  { %137 = vmatpush3.msra.mxu0 %v27_v5 }
   0xb   :  { %138 = vmatprep.subr.mxu0 %v167_v0 }
   0xc   :  { %139 = vmatpush3.msra.mxu0 %v26_v6 }
   0xd   :  { %140 = vmatprep.subr.mxu0 %v167_v0 }
   0xe   :  { %141 = vmatpush3.msra.mxu0 %v25_v7 }
   0xf   :  { %142 = vmatprep.subr.mxu0 %v167_v0 }
  0x10   :  { %143 = vmatpush3.msra.mxu0 %v24_v8 }
  0x11   :  { %144 = vmatprep.subr.mxu0 %v167_v0 }
  0x12   :  { %145 = vmatpush3.msra.mxu0 %v23_v9 }
  0x13   :  { %146 = vmatprep.subr.mxu0 %v167_v0 }
  0x14   :  { %147 = vmatpush3.msra.mxu0 %v22_v10 }
  0x15   :  { %148 = vmatprep.subr.mxu0 %v167_v0 }
  0x16   :  { %149 = vmatpush3.msra.mxu0 %v21_v11 }
  0x17   :  { %150 = vmatprep.subr.mxu0 %v167_v0 }
  0x18   :  { %151 = vmatpush3.msra.mxu0 %v20_v12 }
  0x19   :  { %152 = vmatprep.subr.mxu0 %v167_v0 }
  0x1a   :  { %153 = vmatpush3.msra.mxu0 %v19_v13 }
  0x1b   :  { %154 = vmatprep.subr.mxu0 %v167_v0 }
  0x1c   :  { %155 = vmatpush3.msra.mxu0 %v18_v14 }
  0x1d   :  { %156 = vmatprep.subr.mxu0 %v167_v0 }
  0x1e   :  { %157 = vmatpush3.msra.mxu0 %v17_v15 }
  0x1f   :  { %158 = vmatprep.subr.mxu0 %v167_v0 }
  0x20   :  { %159 = vmatpush3.msra.mxu0 %v16_v16 }
  0x21   :  { %161 = vmatmul.mubr.f32.vlgmr.msra.gmra.mxu0 %v15_v17 }
  0xe1   :  { %v100_v19 = vpop.f32.mrf.mxu0 }
  0xe2   :  { %v101_v20 = vadd.f32 %v100_v19, %v33_v18 }
  0xe3   :  { %v162_v21 = vpop.f32.mrf.mxu0 }
  0xe4   :  { %165 = vtanh.f32 %v101_v20 }
  0xf1   :  { %v166_v22 = vpop.eup %165 }
  0xf2   :  { %106 = vst.msk [vmem:[%s249_s3] sm:$0x3] %vm105_vm1, %v166_v22 }

</bundles_post_ra>
